<compile_context>
chip_gen: v5e
topology: v5e:2x2
jax: 0.10.0
libtpu: 0.0.40
codegen_flags: <defaults>
</compile_context>

<pallas_src>
import jax
import jax.numpy as jnp
from jax.experimental import pallas as pl
from jax.experimental.pallas import tpu as pltpu


def _round_up(x, m):
    return (x + m - 1) // m * m


def _ensemble_kernel(x_ref, w_all_ref, b_all_ref, wc_ref, bc_ref, o_ref):
    """Two-stage path: (TB, D) @ (D, MCp) -> bias -> (TB, MCp) @ (MCp, Cp) -> bias."""
    x = x_ref[...]
    # Stage 1: all M sub-model linears as ONE wide matmul (no concat needed —
    # the merged weight already lays sub-model outputs out along lanes).
    cat = jnp.dot(x, w_all_ref[...], preferred_element_type=jnp.float32)
    cat = cat + b_all_ref[...].astype(jnp.float32)
    # Stage 2: classifier.
    out = jnp.dot(cat.astype(wc_ref.dtype), wc_ref[...],
                  preferred_element_type=jnp.float32)
    out = out + bc_ref[...].astype(jnp.float32)
    o_ref[...] = out.astype(o_ref.dtype)


def _fused_kernel(x_ref, w_ref, b_ref, o_ref):
    """Fully algebraically fused path: single (TB, D) @ (D, Cp) matmul + bias."""
    out = jnp.dot(x_ref[...], w_ref[...], preferred_element_type=jnp.float32)
    out = out + b_ref[...].astype(jnp.float32)
    o_ref[...] = out.astype(o_ref.dtype)


def linear_ensemble_forward(x, w_models, b_models, w_cls, b_cls, *,
                            tile_b=None, compute_dtype=None, fuse_linear=False):
    """x: (B, D); w_models: (M, D, C); b_models: (M, C); w_cls: (M*C, C);
    b_cls: (C,) or (1, C).  Returns (B, C) float32."""
    B, D = x.shape
    M, D2, C = w_models.shape
    assert D2 == D
    assert w_cls.shape == (M * C, C)
    f32 = jnp.float32

    # ---- wrapper-side weight preprocessing (plain XLA, exact) ----
    # concat_m(x @ Wm[m]) == x @ W_all   with  W_all[:, m*C + c] = Wm[m, :, c]
    w_all = jnp.transpose(w_models, (1, 0, 2)).reshape(D, M * C).astype(f32)
    b_all = b_models.reshape(1, M * C).astype(f32)
    w_c = w_cls.astype(f32)
    b_c = jnp.reshape(b_cls, (1, C)).astype(f32)

    # Lane-dense zero padding of hidden (M*C) and output (C) widths to x128.
    MC_pad = _round_up(M * C, 128)
    C_pad = _round_up(C, 128)
    w_all = jnp.pad(w_all, ((0, 0), (0, MC_pad - M * C)))
    b_all = jnp.pad(b_all, ((0, 0), (0, MC_pad - M * C)))
    w_c = jnp.pad(w_c, ((0, MC_pad - M * C), (0, C_pad - C)))
    b_c = jnp.pad(b_c, ((0, 0), (0, C_pad - C)))

    if fuse_linear:
        # Both stages are linear -> collapse exactly (in real arithmetic):
        #   out = x @ (W_all @ Wc) + (b_all @ Wc + bc)
        w_fused = w_all @ w_c                       # (D, C_pad)
        b_fused = b_all @ w_c + b_c                 # (1, C_pad), kept in f32

    cdtype = jnp.dtype(compute_dtype) if compute_dtype is not None else x.dtype
    x_c = x.astype(cdtype)

    # ---- batch tiling: multiple-of-8 tiles, pipelined / megacore-parallel ----
    if tile_b is None:
        tile_b = min(512, _round_up(B, 8))
    tile_b = max(8, _round_up(tile_b, 8))
    B_pad = _round_up(B, tile_b)
    if B_pad != B:
        x_c = jnp.pad(x_c, ((0, B_pad - B), (0, 0)))
    grid = (B_pad // tile_b,)

    itemsize = jnp.dtype(cdtype).itemsize
    if fuse_linear:
        w_fused = w_fused.astype(cdtype)
        operands = (x_c, w_fused, b_fused)
        in_specs = [
            pl.BlockSpec((tile_b, D), lambda i: (i, 0)),     # x tile (streamed)
            pl.BlockSpec((D, C_pad), lambda i: (0, 0)),      # fused weight (const)
            pl.BlockSpec((1, C_pad), lambda i: (0, 0)),      # fused bias (const)
        ]
        kernel = _fused_kernel
        weight_bytes = D * C_pad * itemsize + C_pad * 4
    else:
        w_all = w_all.astype(cdtype)
        w_c = w_c.astype(cdtype)
        operands = (x_c, w_all, b_all, w_c, b_c)
        in_specs = [
            pl.BlockSpec((tile_b, D), lambda i: (i, 0)),     # x tile (streamed)
            pl.BlockSpec((D, MC_pad), lambda i: (0, 0)),     # merged sub-model W
            pl.BlockSpec((1, MC_pad), lambda i: (0, 0)),     # merged sub-model b
            pl.BlockSpec((MC_pad, C_pad), lambda i: (0, 0)), # classifier W
            pl.BlockSpec((1, C_pad), lambda i: (0, 0)),      # classifier b
        ]
        kernel = _ensemble_kernel
        weight_bytes = (D * MC_pad + MC_pad * C_pad) * itemsize + (MC_pad + C_pad) * 4

    # VMEM budget: double-buffered x tile + out tile + (double-buffered) weights.
    # Weight index_maps are constant so they are only DMA'd once, but their
    # buffers are still allocated; budget them explicitly (matters on v7x 64MiB).
    vmem_est = (2 * tile_b * D * itemsize
                + 2 * tile_b * C_pad * 4
                + 2 * weight_bytes)
    vmem_limit = int(min(max(4 * vmem_est, 4 << 20), 32 << 20))

    out_padded = pl.pallas_call(
        kernel,
        out_shape=jax.ShapeDtypeStruct((B_pad, C_pad), jnp.float32),
        grid_spec=pltpu.PrefetchScalarGridSpec(
            num_scalar_prefetch=0,
            grid=grid,
            in_specs=in_specs,
            out_specs=pl.BlockSpec((tile_b, C_pad), lambda i: (i, 0)),
        ),
        compiler_params=pltpu.CompilerParams(
            dimension_semantics=("parallel",),
            vmem_limit_bytes=vmem_limit,
        ),
    )(*operands)

    return out_padded[:B, :C]


def reference_forward(x, w_models, b_models, w_cls, b_cls):
    """Pure-JAX reference mirroring the PyTorch forward exactly."""
    feats = [x @ w_models[m] + b_models[m] for m in range(w_models.shape[0])]
    cat = jnp.concatenate(feats, axis=1)
    return cat @ w_cls + jnp.reshape(b_cls, (1, -1))


if __name__ == "__main__":
    # Small, deterministic problem: 3 linear sub-models, class_num = 16.
    B = 8    # batch
    D = 32   # in_features of each sub-model
    C = 16   # class_num
    M = 3    # num_models

    key = jax.random.PRNGKey(0)
    kx, kwm, kbm, kwc, kbc = jax.random.split(key, 5)

    x = jax.random.normal(kx, (B, D), dtype=jnp.float32)
    w_models = jax.random.normal(kwm, (M, D, C), dtype=jnp.float32) * 0.05   # (in,out)
    b_models = jax.random.normal(kbm, (M, C), dtype=jnp.float32) * 0.05
    w_cls = jax.random.normal(kwc, (M * C, C), dtype=jnp.float32) * 0.05     # (in,out)
    b_cls = jax.random.normal(kbc, (C,), dtype=jnp.float32) * 0.05

    ref = reference_forward(x, w_models, b_models, w_cls, b_cls)

    # Two-stage kernel (same FP summation order as the module).
    out = jax.block_until_ready(
        linear_ensemble_forward(x, w_models, b_models, w_cls, b_cls))
    assert out.shape == (B, C)
    assert jnp.allclose(out, ref, atol=1e-4, rtol=1e-4), "two-stage kernel mismatch"

    # Fully fused kernel (exact algebra, different FP order -> looser tolerance).
    out_fused = jax.block_until_ready(
        linear_ensemble_forward(x, w_models, b_models, w_cls, b_cls,
                                fuse_linear=True))
    assert jnp.allclose(out_fused, ref, atol=1e-3, rtol=1e-3), "fused kernel mismatch"

    print("KERNEL_OK")
</pallas_src>

<mosaic_0001>
module attributes {stable_mosaic.version = 11 : i64} {
  func.func @_ensemble_kernel(%arg0: i32, %arg1: memref<8x32xf32, #tpu.memory_space<vmem>>, %arg2: memref<32x128xf32, #tpu.memory_space<vmem>>, %arg3: memref<1x128xf32, #tpu.memory_space<vmem>>, %arg4: memref<128x128xf32, #tpu.memory_space<vmem>>, %arg5: memref<1x128xf32, #tpu.memory_space<vmem>>, %arg6: memref<8x128xf32, #tpu.memory_space<vmem>>) attributes {dimension_semantics = [#tpu.dimension_semantics<parallel>], iteration_bounds = array<i64: 1>, scalar_prefetch = 0 : i64, scratch_operands = 0 : i64, tpu.core_type = #tpu.core_type<tc>, window_params = [{transform_indices = @transform_0, window_bounds = array<i64: 8, 32>}, {pipeline_mode = #tpu.pipeline_mode<synchronous>, transform_indices = @transform_1, window_bounds = array<i64: 32, 128>}, {pipeline_mode = #tpu.pipeline_mode<synchronous>, transform_indices = @transform_2, window_bounds = array<i64: 1, 128>}, {pipeline_mode = #tpu.pipeline_mode<synchronous>, transform_indices = @transform_3, window_bounds = array<i64: 128, 128>}, {pipeline_mode = #tpu.pipeline_mode<synchronous>, transform_indices = @transform_4, window_bounds = array<i64: 1, 128>}, {transform_indices = @transform_5, window_bounds = array<i64: 8, 128>}]} {
    %c0 = arith.constant 0 : index
    %c0_0 = arith.constant 0 : index
    %0 = vector.load %arg1[%c0, %c0_0] : memref<8x32xf32, #tpu.memory_space<vmem>>, vector<8x32xf32>
    %c0_1 = arith.constant 0 : index
    %c0_2 = arith.constant 0 : index
    %1 = vector.load %arg2[%c0_1, %c0_2] : memref<32x128xf32, #tpu.memory_space<vmem>>, vector<32x128xf32>
    %cst = arith.constant dense<0.000000e+00> : vector<8x128xf32>
    %2 = tpu.matmul %0, %1, %cst {dimension_numbers = #tpu.dot_dimension_numbers<[1], [0], [0], [1], [0, 0, 1, 1], [], []>} : vector<8x32xf32>, vector<32x128xf32>, vector<8x128xf32> -> vector<8x128xf32>
    %c0_3 = arith.constant 0 : index
    %c0_4 = arith.constant 0 : index
    %3 = vector.load %arg3[%c0_3, %c0_4] : memref<1x128xf32, #tpu.memory_space<vmem>>, vector<1x128xf32>
    %4 = vector.broadcast %3 : vector<1x128xf32> to vector<8x128xf32>
    %5 = arith.addf %2, %4 : vector<8x128xf32>
    %c0_5 = arith.constant 0 : index
    %c0_6 = arith.constant 0 : index
    %6 = vector.load %arg4[%c0_5, %c0_6] : memref<128x128xf32, #tpu.memory_space<vmem>>, vector<128x128xf32>
    %cst_7 = arith.constant dense<0.000000e+00> : vector<8x128xf32>
    %7 = tpu.matmul %5, %6, %cst_7 {dimension_numbers = #tpu.dot_dimension_numbers<[1], [0], [0], [1], [0, 0, 1, 1], [], []>} : vector<8x128xf32>, vector<128x128xf32>, vector<8x128xf32> -> vector<8x128xf32>
    %c0_8 = arith.constant 0 : index
    %c0_9 = arith.constant 0 : index
    %8 = vector.load %arg5[%c0_8, %c0_9] : memref<1x128xf32, #tpu.memory_space<vmem>>, vector<1x128xf32>
    %9 = vector.broadcast %8 : vector<1x128xf32> to vector<8x128xf32>
    %10 = arith.addf %7, %9 : vector<8x128xf32>
    %c0_10 = arith.constant 0 : index
    %c0_11 = arith.constant 0 : index
    %11 = vector.load %arg6[%c0_10, %c0_11] : memref<8x128xf32, #tpu.memory_space<vmem>>, vector<8x128xf32>
    tpu.vector_store %arg6[%c0_10, %c0_11], %10 {strides = array<i32>} : memref<8x128xf32, #tpu.memory_space<vmem>>, vector<8x128xf32>,
    return
  }
  func.func @transform_0(%arg0: i32) -> (i32, i32) {
    %c0_i32 = arith.constant 0 : i32
    %c0_i32_0 = arith.constant 0 : i32
    return %arg0, %c0_i32 : i32, i32
  }
  func.func @transform_1(%arg0: i32) -> (i32, i32) {
    %c0_i32 = arith.constant 0 : i32
    %c0_i32_0 = arith.constant 0 : i32
    %c0_i32_1 = arith.constant 0 : i32
    return %c0_i32, %c0_i32_0 : i32, i32
  }
  func.func @transform_2(%arg0: i32) -> (i32, i32) {
    %c0_i32 = arith.constant 0 : i32
    %c0_i32_0 = arith.constant 0 : i32
    %c0_i32_1 = arith.constant 0 : i32
    return %c0_i32, %c0_i32_0 : i32, i32
  }
  func.func @transform_3(%arg0: i32) -> (i32, i32) {
    %c0_i32 = arith.constant 0 : i32
    %c0_i32_0 = arith.constant 0 : i32
    %c0_i32_1 = arith.constant 0 : i32
    return %c0_i32, %c0_i32_0 : i32, i32
  }
  func.func @transform_4(%arg0: i32) -> (i32, i32) {
    %c0_i32 = arith.constant 0 : i32
    %c0_i32_0 = arith.constant 0 : i32
    %c0_i32_1 = arith.constant 0 : i32
    return %c0_i32, %c0_i32_0 : i32, i32
  }
  func.func @transform_5(%arg0: i32) -> (i32, i32) {
    %c0_i32 = arith.constant 0 : i32
    %c0_i32_0 = arith.constant 0 : i32
    return %arg0, %c0_i32 : i32, i32
  }
}

</mosaic_0001>

<bundles_post_ra>
// kernel: tpu_custom_call.1
= control target key start
LH: loop header
LB: loop body
LE: loop exit
PB: predicated region body
PF: predicated region fallthrough
CT: control target
= control target key end

     0   :  { %10 = vsyncpa [#allocation3], 0  ;;  %s323_s0 = inlined_call_operand.hbm [shape: f32[8,32], index: 0, kind: input, shape index: {}]   ;;  %s324_s1 = inlined_call_operand.hbm [shape: f32[32,128], index: 1, kind: input, shape index: {}]   ;;  %s325_s2 = inlined_call_operand.vmem [shape: f32[1,128], index: 2, kind: input, shape index: {}]   ;;  %s326_s3 = inlined_call_operand.hbm [shape: f32[128,128], index: 3, kind: input, shape index: {}]   ;;  %s327_s4 = inlined_call_operand.vmem [shape: f32[1,128], index: 4, kind: input, shape index: {}]   ;;  %s328_s5 = inlined_call_operand.hbm [shape: f32[8,128], index: 5, kind: output, shape index: {}]  }
   0x1   :  { %11 = vsyncpa [#allocation6], 0  ;;  %s28_s20 = sshll.u32 %s324_s1, 4  ;;  %s29_s20 = int_to_ptr.hbm [resolvable:$true] %s28_s20 }
   0x2   :  { %12 = vsyncpa [#allocation4], 0  ;;  %s269_s21 = smov [#allocation5]   ;;  %s18_s25 = sshll.u32 %s323_s0, 4  ;;  %s19_s25 = int_to_ptr.hbm [resolvable:$true] %s18_s25 }
   0x3   :  { %s30_s22 = sshll.u32 %s269_s21, 4  ;;  %s270_s26 = smov 128   ;;  %s31_s22 = int_to_ptr.vmem [resolvable:$true] %s30_s22 }
   0x4   :  { %s271_s27 = smov 8   ;;  %s272_s28 = smov [#allocation2]  }
   0x5   :  { %36 = dma.hbm_to_vmem [thread:$0]  %s29_s20, 512, %s31_s22, [#allocation6], %s270_s26, %s270_s26, %s271_s27  }
   0x6   :  { %s20_s29 = sshll.u32 %s272_s28, 4  ;;  %s43_s7 = sshll.u32 %s326_s3, 4  ;;  %s21_s29 = int_to_ptr.vmem [resolvable:$true] %s20_s29  ;;  %s44_s7 = int_to_ptr.hbm [resolvable:$true] %s43_s7 }
   0x7   :  { %23 = dma.hbm_to_vmem [thread:$0]  %s19_s25, 128, %s21_s29, [#allocation3]  }
   0x8   :  { %s273_s1 = smov [#allocation7]  }
   0x9   :  { %s45_s8 = sshll.u32 %s273_s1, 4  ;;  %s46_s8 = int_to_ptr.vmem [resolvable:$true] %s45_s8 }
   0xa   :  { %51 = dma.hbm_to_vmem [thread:$0]  %s44_s7, 2048, %s46_s8, [#allocation6], %s270_s26, %s270_s26, %s271_s27  }
   0xb   :  { %263 = dma.done.wait [#allocation3], 128  }
   0xc   :  { %264 = vsyncadd [#allocation3], 4294967168 }
   0xd   :  { %265 = dma.done.wait [#allocation6], 2560  }
   0xe   :  { %266 = vsyncadd [#allocation6], 4294964736  ;;  %v70_v0 = vld [vmem:[#allocation5 + $0x18] sm:$0xff]  ;;  %v69_v1 = vld [vmem:[#allocation5 + $0x10] sm:$0xff]  ;;  %vm75_vm0 = vcmask 261120   ;;  %s274_s11 = smov [#allocation8]  }
   0xf   :  { %91 = vmatpush.msra.mxu0 %v70_v0  ;;  %v114_v2 = vld [vmem:[#allocation7 + $0x78] sm:$0xff]  ;;  %v68_v3 = vld [vmem:[#allocation5 + $0x8] sm:$0xff]  ;;  %v113_v4 = vld [vmem:[#allocation7 + $0x70] sm:$0xff]  ;;  %s145_s12 = sshll.u32 %s274_s11, 4  ;;  %s147_s15 = sshll.u32 %s328_s5, 4  ;;  %s146_s12 = int_to_ptr.vmem [resolvable:$true] %s145_s12  ;;  %s148_s15 = int_to_ptr.hbm [resolvable:$true] %s147_s15 }
  0x10   :  { %119 = vmatpush.msra.mxu1 %v114_v2  ;;  %v112_v5 = vld [vmem:[#allocation7 + $0x68] sm:$0xff]  ;;  %v67_v6 = vld [vmem:[#allocation5] sm:$0xff]  ;;  %v66_v7 = vld [vmem:[#allocation2] sm:$0xff] }
  0x11   :  { %92 = vmatpush.msra.mxu0 %v69_v1  ;;  %v111_v8 = vld [vmem:[#allocation7 + $0x60] sm:$0xff]  ;;  %v110_v9 = vld [vmem:[#allocation7 + $0x58] sm:$0xff]  ;;  %v109_v10 = vld [vmem:[#allocation7 + $0x50] sm:$0xff] }
  0x12   :  { %120 = vmatpush.msra.mxu1 %v113_v4  ;;  %v108_v11 = vld [vmem:[#allocation7 + $0x48] sm:$0xff]  ;;  %v107_v12 = vld [vmem:[#allocation7 + $0x40] sm:$0xff]  ;;  %v106_v13 = vld [vmem:[#allocation7 + $0x38] sm:$0xff] }
  0x13   :  { %93 = vmatpush.msra.mxu0 %v68_v3  ;;  %v105_v14 = vld [vmem:[#allocation7 + $0x30] sm:$0xff]  ;;  %v104_v15 = vld [vmem:[#allocation7 + $0x28] sm:$0xff]  ;;  %v103_v16 = vld [vmem:[#allocation7 + $0x20] sm:$0xff] }
  0x14   :  { %121 = vmatpush.msra.mxu1 %v112_v5  ;;  %v102_v17 = vld [vmem:[#allocation7 + $0x18] sm:$0xff]  ;;  %v101_v18 = vld [vmem:[#allocation7 + $0x10] sm:$0xff]  ;;  %v100_v19 = vld [vmem:[#allocation7 + $0x8] sm:$0xff] }
  0x15   :  { %94 = vmatpush.msra.mxu0 %v67_v6  ;;  %v99_v20 = vld [vmem:[#allocation7] sm:$0xff]  ;;  %v165_v21 = vld [vmem:[%s325_s2] ss:$0 sm:$0xff] }
  0x16   :  { %158 = vmatmul.msk.f32.vlgmr.msra.gmra.mxu0 %vm75_vm0, %v66_v7  ;;  %122 = vmatpush.msra.mxu1 %v111_v8  ;;  %v166_v24 = vld [vmem:[%s327_s4] ss:$0 sm:$0xff] }
  0x18   :  { %123 = vmatpush.msra.mxu1 %v110_v9 }
  0x1a   :  { %124 = vmatpush.msra.mxu1 %v109_v10 }
  0x1c   :  { %125 = vmatpush.msra.mxu1 %v108_v11 }
  0x1e   :  { %126 = vmatpush.msra.mxu1 %v107_v12 }
  0x20   :  { %127 = vmatpush.msra.mxu1 %v106_v13 }
  0x22   :  { %128 = vmatpush.msra.mxu1 %v105_v14 }
  0x24   :  { %129 = vmatpush.msra.mxu1 %v104_v15 }
  0x26   :  { %130 = vmatpush.msra.mxu1 %v103_v16 }
  0x28   :  { %131 = vmatpush.msra.mxu1 %v102_v17 }
  0x2a   :  { %132 = vmatpush.msra.mxu1 %v101_v18 }
  0x2c   :  { %133 = vmatpush.msra.mxu1 %v100_v19 }
  0x2e   :  { %134 = vmatpush.msra.mxu1 %v99_v20 }
  0x93   :  { %v96_v22 = vpop.f32.mrf.mxu0 }
  0x94   :  { %v97_v23 = vadd.f32 %v165_v21, %v96_v22 }
  0x96   :  { %135 = vmatmul.f32.vlgmr.msra.gmra.mxu1 %v97_v23 }
 0x113   :  { %v136_v25 = vpop.f32.mrf.mxu1 }
 0x114   :  { %v137_v26 = vadd.f32 %v166_v24, %v136_v25 }
 0x116   :  { %139 = vst [vmem:[#allocation8] sm:$0xff] %v137_v26 }
 0x117   :  { %150 = dma.vmem_to_hbm [thread:$0]  %s146_s12, 128, %s148_s15, [#allocation4]  }
 0x118   :  { %267 = dma.done.wait [#allocation4], 128  }
 0x119   :  { %268 = vsyncadd [#allocation4], 4294967168 }
 0x11a   :  { %155 = vsyncpa [#allocation3], 1 }
 0x11b   :  { %156 = vsyncpa [#allocation6], 1 }
 0x11c   :  { %157 = vsyncpa [#allocation4], 1 }

</bundles_post_ra>
